<compile_context>
chip_gen: v7x
topology: tpu7x:2x2x1
jax: 0.10.0
libtpu: 0.0.40
codegen_flags: <defaults>
</compile_context>

<pallas_src>
import functools

import jax
import jax.numpy as jnp
from jax import lax
from jax.experimental import pallas as pl
from jax.experimental.pallas import tpu as pltpu

MATMUL_DTYPE = jnp.float32   # knob: jnp.bfloat16 for bf16 MXU operands


# ---------------------------------------------------------------------------
# Pallas kernel: Chebyshev supports of orders 1..K-1 (order 0 == identity is
# applied implicitly inside the layer kernel, so it is never materialized).
# ---------------------------------------------------------------------------
def _supports_kernel(e_ref, out_ref, *, cheb_k):
    E = e_ref[...]                                           # (N, D)
    N = E.shape[0]
    A = lax.dot_general(E, E, (((1,), (1,)), ((), ())),
                        preferred_element_type=jnp.float32)  # E @ E.T
    A = jnp.maximum(A, 0.0)
    S = jax.nn.softmax(A, axis=1)

    row = lax.broadcasted_iota(jnp.int32, (N, N), 0)
    col = lax.broadcasted_iota(jnp.int32, (N, N), 1)
    eye = (row == col).astype(jnp.float32)

    out_ref[0] = S
    prev_prev, prev = eye, S
    for k in range(2, cheb_k):
        cur = 2.0 * jnp.dot(S, prev, preferred_element_type=jnp.float32) - prev_prev
        out_ref[k - 1] = cur
        prev_prev, prev = prev, cur


def compute_supports_stacked(node_embeddings, cheb_k, bb):
    """((K-1)*bb*N, bb*N) row-stacked, batch-block-diagonal Chebyshev supports."""
    N = node_embeddings.shape[0]
    sup = pl.pallas_call(
        functools.partial(_supports_kernel, cheb_k=cheb_k),
        out_shape=jax.ShapeDtypeStruct((cheb_k - 1, N, N), jnp.float32),
        in_specs=[pl.BlockSpec(memory_space=pltpu.MemorySpace.VMEM)],
        out_specs=pl.BlockSpec(memory_space=pltpu.MemorySpace.VMEM),
    )(node_embeddings)
    # One-time glue: block-diagonal over the folded batch chunk, k-major rows.
    # The layer kernel consumes this layout as-is (no per-timestep relayout).
    eye_bb = jnp.eye(bb, dtype=jnp.float32)
    svst = jnp.einsum('pq,knm->kpnqm', eye_bb, sup)
    return svst.reshape((cheb_k - 1) * bb * N, bb * N).astype(MATMUL_DTYPE)


# ---------------------------------------------------------------------------
# Pallas kernel: one GCRN layer, whole sequence per grid step (grid = chunks)
# ---------------------------------------------------------------------------
def _layer_kernel(x_ref, h0_ref, svst_ref, pxall_ref, phg_ref, phu_ref,
                  ereg_ref, ereu_ref, redgz_ref, redgr_ref, redu_ref,
                  bgz_ref, bgr_ref, bu_ref, out_ref, *, cheb_k, d2h):
    T, R, _ = x_ref.shape
    km1 = cheb_k - 1

    def gconv(v):
        # All Chebyshev orders k >= 1 in ONE row-stacked MXU matmul; the k = 0
        # (identity) term is v itself.  Output layout: (R, K*C), lane-stacked.
        gk = jnp.dot(svst_ref[...], v.astype(MATMUL_DTYPE),
                     preferred_element_type=jnp.float32)         # ((K-1)*R, C)
        parts = [v] + [gk[i * R:(i + 1) * R, :] for i in range(km1)]
        return jnp.concatenate(parts, axis=-1)

    def mm(a, b_ref):
        return jnp.dot(a.astype(MATMUL_DTYPE), b_ref[...],
                       preferred_element_type=jnp.float32)

    def step(t, s):
        x_t = x_ref[t]                                           # (R, Cin)
        gx = gconv(x_t)                                          # (R, K*Cin)
        gs = gconv(s)                                            # (R, K*H)

        # Fused pool matmuls; gate and update share the x-part slab.
        qx = mm(gx, pxall_ref)                                   # (R, D*3H)
        qg = qx[:, :d2h] + mm(gs, phg_ref)                       # (R, D*2H)

        # Embedding-dim reduction: elementwise * lane-repeated E, then one
        # matmul against a 0/1 block-identity matrix (z / r split is baked
        # into the constant reduction matrices and biases).
        eg = ereg_ref[...] * qg
        z = jax.nn.sigmoid(mm(eg, redgz_ref) + bgz_ref[...])     # (R, H)
        r = jax.nn.sigmoid(mm(eg, redgr_ref) + bgr_ref[...])     # (R, H)

        gzs = gconv(z * s)                                       # (R, K*H)
        qu = qx[:, d2h:] + mm(gzs, phu_ref)                      # (R, D*H)
        hc = jnp.tanh(mm(ereu_ref[...] * qu, redu_ref) + bu_ref[...])

        h = r * s + (1.0 - r) * hc
        out_ref[t] = h
        return h

    lax.fori_loop(0, T, step, h0_ref[...], unroll=(T <= 16))


def _layer_cost(G, T, R, c_in, H, K, D):
    per_step = (
        2 * (K - 1) * R * R * (c_in + 2 * H)        # fused Chebyshev matmuls (x, s, z*s)
        + 2 * R * K * c_in * D * 3 * H              # x-part pool slab (gate + update)
        + 2 * R * K * H * D * 2 * H                 # state-part gate pool slab
        + 2 * R * K * H * D * H                     # candidate-part update pool slab
        + 2 * R * D * 2 * H * 2 * H                 # gate reduction matmuls (z and r)
        + 2 * R * D * H * H                         # update reduction matmul
        + R * (6 * D * H + 12 * H)                  # E-repeat multiplies + GRU gating
    )
    trans = 3 * R * H
    const_bytes = 4 * ((K - 1) * R * R
                       + K * (c_in + 2 * H) * D * 3 * H
                       + R * D * 3 * H + 5 * D * H * H + R * 3 * H)
    io_bytes = 4 * G * (T * R * (c_in + H) + R * H)
    return pl.CostEstimate(flops=int(per_step * T * G),
                           transcendentals=int(trans * T * G),
                           bytes_accessed=int(io_bytes + const_bytes))


def gcrn_layer(x_chunked, h0_chunked, svst, pxall, phg, phu,
               ereg, ereu, redgz, redgr, redu, bgz, bgr, bu,
               *, cheb_k, hidden):
    G, T, R, c_in = x_chunked.shape
    d2h = phg.shape[1]
    D = d2h // (2 * hidden)

    def const(a):
        return pl.BlockSpec(a.shape, lambda g: (0,) * a.ndim)

    return pl.pallas_call(
        functools.partial(_layer_kernel, cheb_k=cheb_k, d2h=d2h),
        out_shape=jax.ShapeDtypeStruct((G, T, R, hidden), jnp.float32),
        grid_spec=pltpu.PrefetchScalarGridSpec(
            num_scalar_prefetch=0,
            grid=(G,),
            in_specs=[
                # streamed per batch chunk: whole sequence in one block
                pl.BlockSpec((None, T, R, c_in), lambda g: (g, 0, 0, 0)),
                pl.BlockSpec((None, R, hidden), lambda g: (g, 0, 0)),
                # constants: DMA'd once, VMEM resident across the whole layer
                const(svst), const(pxall), const(phg), const(phu),
                const(ereg), const(ereu),
                const(redgz), const(redgr), const(redu),
                const(bgz), const(bgr), const(bu),
            ],
            out_specs=pl.BlockSpec((None, T, R, hidden),
                                   lambda g: (g, 0, 0, 0)),
        ),
        compiler_params=pltpu.CompilerParams(
            dimension_semantics=("parallel",),
            vmem_limit_bytes=48 * 1024 * 1024),
        cost_estimate=_layer_cost(G, T, R, c_in, hidden, cheb_k, D),
    )(x_chunked, h0_chunked, svst, pxall, phg, phu, ereg, ereu,
      redgz, redgr, redu, bgz, bgr, bu)


# ---------------------------------------------------------------------------
# Parameter / constant preparation (plain XLA glue, runs once per layer)
# ---------------------------------------------------------------------------
def init_params(key, dim_in, dim_out, cheb_k, embed_dim, num_layers):
    params = []
    for layer in range(num_layers):
        d_in = dim_in if layer == 0 else dim_out
        key, k1, k2, k3, k4 = jax.random.split(key, 5)
        params.append(dict(
            gate_w_pool=0.1 * jax.random.normal(
                k1, (embed_dim, cheb_k, d_in + dim_out, 2 * dim_out), jnp.float32),
            gate_b_pool=0.1 * jax.random.normal(
                k2, (embed_dim, 2 * dim_out), jnp.float32),
            upd_w_pool=0.1 * jax.random.normal(
                k3, (embed_dim, cheb_k, d_in + dim_out, dim_out), jnp.float32),
            upd_b_pool=0.1 * jax.random.normal(
                k4, (embed_dim, dim_out), jnp.float32),
        ))
    return params


def _prep_layer_constants(p, E, d_in, cheb_k, hidden, bb):
    D = E.shape[1]
    H = hidden

    def slab(pool, lo, hi, out_w):
        # (D, K, C, O) -> (K*C, D*O): rows k-major / c-minor, cols d-major / o-minor.
        part = jnp.transpose(pool[:, :, lo:hi, :], (1, 2, 0, 3))
        return part.reshape(cheb_k * (hi - lo), D * out_w)

    gw, uw = p['gate_w_pool'], p['upd_w_pool']
    pxall = jnp.concatenate([slab(gw, 0, d_in, 2 * H), slab(uw, 0, d_in, H)], axis=1)
    phg = slab(gw, d_in, d_in + H, 2 * H)
    phu = slab(uw, d_in, d_in + H, H)

    # lane-repeated node embeddings: ere[b*N + n, d*O + o] = E[n, d]
    ereg = jnp.tile(jnp.repeat(E, 2 * H, axis=1), (bb, 1))
    ereu = jnp.tile(jnp.repeat(E, H, axis=1), (bb, 1))

    # 0/1 block-identity reduction matrices (gate one pre-split into z / r)
    redg = jnp.tile(jnp.eye(2 * H, dtype=jnp.float32), (D, 1))   # (D*2H, 2H)
    redgz, redgr = redg[:, :H], redg[:, H:]
    redu = jnp.tile(jnp.eye(H, dtype=jnp.float32), (D, 1))       # (D*H, H)

    bgate = jnp.tile(E @ p['gate_b_pool'], (bb, 1))               # (bb*N, 2H)
    bgz, bgr = bgate[:, :H], bgate[:, H:]
    bu = jnp.tile(E @ p['upd_b_pool'], (bb, 1))                   # (bb*N, H)

    cast = lambda a: a.astype(MATMUL_DTYPE)
    return (cast(pxall), cast(phg), cast(phu), ereg, ereu,
            cast(redgz), cast(redgr), cast(redu), bgz, bgr, bu)


def gcrn_forward(x, init_state, node_embeddings, params, cheb_k, hidden):
    B, T, N, _ = x.shape
    assert cheb_k >= 2, "cheb_k must be >= 2 (eye + adaptive support)"
    # Fold a chunk of the batch into the matmul row dimension (~128 rows);
    # remaining chunks become a "parallel" grid axis (megacore on v7x).
    max_bb = max(1, 128 // N)
    bb = max(c for c in range(1, B + 1) if B % c == 0 and c <= max_bb)
    G, R = B // bb, bb * N

    svst = compute_supports_stacked(node_embeddings, cheb_k, bb)

    def to_chunks(a):       # (B, T, N, C) -> (G, T, bb*N, C)
        C = a.shape[-1]
        return a.reshape(G, bb, T, N, C).transpose(0, 2, 1, 3, 4).reshape(G, T, R, C)

    def from_chunks(a):     # (G, T, bb*N, C) -> (B, T, N, C)
        C = a.shape[-1]
        return a.reshape(G, T, bb, N, C).transpose(0, 2, 1, 3, 4).reshape(B, T, N, C)

    cur = to_chunks(x)
    output_hidden = []
    for layer, p in enumerate(params):
        d_in = cur.shape[-1]
        consts = _prep_layer_constants(p, node_embeddings, d_in, cheb_k, hidden, bb)
        h0 = init_state[layer].reshape(G, R, hidden)
        cur = gcrn_layer(cur, h0, svst, *consts, cheb_k=cheb_k, hidden=hidden)
        output_hidden.append(cur[:, -1].reshape(B, N, hidden))
    return from_chunks(cur), output_hidden


# ---------------------------------------------------------------------------
# Pure-JAX reference (mirrors the PyTorch forward) for the correctness check
# ---------------------------------------------------------------------------
def _agcn_ref(x, E, w_pool, b_pool, cheb_k):
    N = E.shape[0]
    supports = jax.nn.softmax(jnp.maximum(E @ E.T, 0.0), axis=1)
    ss = [jnp.eye(N, dtype=jnp.float32), supports]
    for _ in range(2, cheb_k):
        ss.append(2.0 * supports @ ss[-1] - ss[-2])
    sup = jnp.stack(ss, axis=0)
    weights = jnp.einsum('nd,dkio->nkio', E, w_pool)
    bias = E @ b_pool
    x_g = jnp.einsum('knm,bmc->bknc', sup, x).transpose(0, 2, 1, 3)
    return jnp.einsum('bnki,nkio->bno', x_g, weights) + bias


def _cell_ref(x, state, E, p, cheb_k, hidden):
    xs = jnp.concatenate([x, state], axis=-1)
    zr = jax.nn.sigmoid(_agcn_ref(xs, E, p['gate_w_pool'], p['gate_b_pool'], cheb_k))
    z, r = zr[..., :hidden], zr[..., hidden:]
    cand = jnp.concatenate([x, z * state], axis=-1)
    hc = jnp.tanh(_agcn_ref(cand, E, p['upd_w_pool'], p['upd_b_pool'], cheb_k))
    return r * state + (1.0 - r) * hc


def gcrn_ref(x, init_state, E, params, cheb_k, hidden):
    T = x.shape[1]
    current = x
    hidden_out = []
    for layer, p in enumerate(params):
        state = init_state[layer]
        states = []
        for t in range(T):
            state = _cell_ref(current[:, t], state, E, p, cheb_k, hidden)
            states.append(state)
        hidden_out.append(state)
        current = jnp.stack(states, axis=1)
    return current, hidden_out


# ---------------------------------------------------------------------------
if __name__ == "__main__":
    B, T, N = 2, 8, 16
    DIM_IN, HID, CHEB_K, EMB, LAYERS = 4, 32, 3, 8, 2

    key = jax.random.PRNGKey(0)
    key, kx, ke = jax.random.split(key, 3)
    x = jax.random.normal(kx, (B, T, N, DIM_IN), jnp.float32)
    node_embeddings = jax.random.normal(ke, (N, EMB), jnp.float32)
    init_state = jnp.zeros((LAYERS, B, N, HID), jnp.float32)   # == init_hidden()
    params = init_params(key, DIM_IN, HID, CHEB_K, EMB, LAYERS)

    out, hidden = gcrn_forward(x, init_state, node_embeddings, params, CHEB_K, HID)
    out = jax.block_until_ready(out)
    assert out.shape == (B, T, N, HID)
    assert hidden[0].shape == (B, N, HID)

    ref_out, ref_hidden = gcrn_ref(x, init_state, node_embeddings, params, CHEB_K, HID)
    max_err = float(jnp.max(jnp.abs(out - ref_out)))
    max_err_h = float(jnp.max(jnp.abs(hidden[-1] - ref_hidden[-1])))
    assert max_err < 2e-3, f"output mismatch vs reference: max abs err {max_err}"
    assert max_err_h < 2e-3, f"hidden mismatch vs reference: max abs err {max_err_h}"

    print("KERNEL_OK")
</pallas_src>

<mosaic_0001>
module attributes {stable_mosaic.version = 11 : i64} {
  func.func @_supports_kernel(%arg0: memref<16x8xf32, #tpu.memory_space<vmem>>, %arg1: memref<2x16x16xf32, #tpu.memory_space<vmem>>) attributes {dimension_semantics = [], scalar_prefetch = 0 : i64, scratch_operands = 0 : i64, tpu.core_type = #tpu.core_type<tc>} {
    %c0 = arith.constant 0 : index
    %c0_0 = arith.constant 0 : index
    %0 = vector.load %arg0[%c0, %c0_0] : memref<16x8xf32, #tpu.memory_space<vmem>>, vector<16x8xf32>
    %cst = arith.constant dense<0.000000e+00> : vector<16x16xf32>
    %1 = tpu.matmul %0, %0, %cst {dimension_numbers = #tpu.dot_dimension_numbers<[1], [1], [0], [0], [0, 0, 1, 0], [], []>} : vector<16x8xf32>, vector<16x8xf32>, vector<16x16xf32> -> vector<16x16xf32>
    %cst_1 = arith.constant 0.000000e+00 : f32
    %2 = vector.broadcast %cst_1 : f32 to vector<16x16xf32>
    %3 = arith.maximumf %1, %2 : vector<16x16xf32>
    %cst_2 = arith.constant dense<0xFF800000> : vector<16xf32>
    %4 = vector.multi_reduction <maximumf>, %3, %cst_2 [1] : vector<16x16xf32> to vector<16xf32>
    %cst_3 = arith.constant 0xFF800000 : f32
    %5 = vector.broadcast %cst_3 : f32 to vector<16xf32>
    %6 = arith.maximumf %5, %4 : vector<16xf32>
    %7 = vector.shape_cast %6 : vector<16xf32> to vector<16x1xf32>
    %8 = vector.broadcast %7 : vector<16x1xf32> to vector<16x16xf32>
    %9 = arith.subf %3, %8 : vector<16x16xf32>
    %10 = math.exp %9 : vector<16x16xf32>
    %cst_4 = arith.constant dense<0.000000e+00> : vector<16xf32>
    %11 = vector.multi_reduction <add>, %10, %cst_4 [1] : vector<16x16xf32> to vector<16xf32>
    %12 = vector.shape_cast %11 : vector<16xf32> to vector<16x1xf32>
    %13 = vector.broadcast %12 : vector<16x1xf32> to vector<16x16xf32>
    %14 = arith.divf %10, %13 : vector<16x16xf32>
    %15 = tpu.iota {dimensions = array<i32: 0>} : vector<16x16xi32>
    %16 = tpu.iota {dimensions = array<i32: 1>} : vector<16x16xi32>
    %17 = arith.cmpi eq, %15, %16 : vector<16x16xi32>
    %18 = arith.extui %17 : vector<16x16xi1> to vector<16x16xi32>
    %19 = arith.sitofp %18 : vector<16x16xi32> to vector<16x16xf32>
    %c0_5 = arith.constant 0 : index
    %c0_6 = arith.constant 0 : index
    %c0_7 = arith.constant 0 : index
    %20 = vector.load %arg1[%c0_5, %c0_6, %c0_7] : memref<2x16x16xf32, #tpu.memory_space<vmem>>, vector<1x16x16xf32>
    %21 = vector.shape_cast %20 : vector<1x16x16xf32> to vector<16x16xf32>
    %22 = vector.shape_cast %14 : vector<16x16xf32> to vector<1x16x16xf32>
    tpu.vector_store %arg1[%c0_5, %c0_6, %c0_7], %22 {strides = array<i32>} : memref<2x16x16xf32, #tpu.memory_space<vmem>>, vector<1x16x16xf32>,
    %cst_8 = arith.constant dense<0.000000e+00> : vector<16x16xf32>
    %23 = tpu.matmul %14, %14, %cst_8 {dimension_numbers = #tpu.dot_dimension_numbers<[1], [0], [0], [1], [0, 0, 1, 1], [], []>} : vector<16x16xf32>, vector<16x16xf32>, vector<16x16xf32> -> vector<16x16xf32>
    %cst_9 = arith.constant 2.000000e+00 : f32
    %24 = vector.broadcast %cst_9 : f32 to vector<16x16xf32>
    %25 = arith.mulf %24, %23 : vector<16x16xf32>
    %26 = arith.subf %25, %19 : vector<16x16xf32>
    %c1 = arith.constant 1 : index
    %c0_10 = arith.constant 0 : index
    %c0_11 = arith.constant 0 : index
    %27 = vector.load %arg1[%c1, %c0_10, %c0_11] : memref<2x16x16xf32, #tpu.memory_space<vmem>>, vector<1x16x16xf32>
    %28 = vector.shape_cast %27 : vector<1x16x16xf32> to vector<16x16xf32>
    %29 = vector.shape_cast %26 : vector<16x16xf32> to vector<1x16x16xf32>
    tpu.vector_store %arg1[%c1, %c0_10, %c0_11], %29 {strides = array<i32>} : memref<2x16x16xf32, #tpu.memory_space<vmem>>, vector<1x16x16xf32>,
    return
  }
}

</mosaic_0001>

<bundles_post_ra>
// kernel: tpu_custom_call.1
= control target key start
LH: loop header
LB: loop body
LE: loop exit
PB: predicated region body
PF: predicated region fallthrough
CT: control target
= control target key end

     0   :  { %vm11_vm0 = vcmask 64512   ;;  %s353_s0 = inlined_call_operand.vmem [shape: f32[16,8], index: 0, kind: input, shape index: {}]   ;;  %s354_s1 = inlined_call_operand.hbm [shape: f32[2,16,16], index: 1, kind: output, shape index: {}]  }
   0x1   :  { %v9_v0 = vld [vmem:[%s353_s0] sm:$0xff]  ;;  %v10_v1 = vld [vmem:[%s353_s0 + $0x8] sm:$0xff] }
   0x2   :  { %6 = vsyncpa [#allocation3], 0  ;;  %v265_v2 = vpack.c.bf16 %v10_v1, %v9_v0  ;;  %255 = vmatprep.mubr.msk.f32.mxu0 %vm11_vm0, %v9_v0  ;;  %vm95_vm2 = vcmask 130048   ;;  %v118_v26 = vlaneseq  ;;  %v311_v30 = vmov 0.0   ;;  %s312_s0 = smov [#allocation2]  }
   0x3   :  { %vm266_vm1 = vmpackc.low %vm11_vm0, %vm11_vm0  ;;  %s224_s10 = sshll.u32 %s312_s0, 4  ;;  %s225_s10 = int_to_ptr.vmem [resolvable:$true] %s224_s10 }
   0x4   :  { %267 = vmatprep.subr.msk.bf16.mxu0 %vm266_vm1, %v265_v2  ;;  %v119_v27 = vshrl.u32 %v118_v26, 7  ;;  %v122_v29 = vand.u32 127, %v118_v26  ;;  %s287_s11 = scalar_lea.vmem %s225_s10, 512  ;;  %p292_p1 = scmp.lt.s32.totalorder %s225_s10, %s225_s10 }
   0x5   :  { %270 = vmatpush3.bf16.xpose.msk.msra.mxu0 %vm266_vm1, %v265_v2  ;;  %p288_p0 = scmp.ne.s32.totalorder %s225_s10, %s287_s11  ;;  %p293_p2 = scmp.lt.s32.totalorder %s287_s11, %s287_s11 }
   0x6   :  { %v120_v28 = vadd.s32 8, %v119_v27  ;;  %vm123_vm4 = vcmp.eq.s32.totalorder %v119_v27, %v122_v29 }
   0x7   :  { %v239_v34 = vsel %vm123_vm4, 1.0, %v311_v30  ;;  %p294_p3 = por %p293_p2, %p292_p1 }
   0x8   :  { %vm124_vm3 = vcmp.eq.s32.totalorder %v120_v28, %v122_v29 }
   0x9   :  { %v240_v31 = vsel %vm124_vm3, 1.0, %v311_v30  ;;  %p295_p4 = pnand %p294_p3, %p288_p0 }
   0xc   :  { %256 = vmatmul.mubr.msk.f32.vlgmr.msra.gmra.mrb[0].mxu0 %vm11_vm0, %v10_v1 }
  0xdf   :  { %v257_v3 = vpop.f32.mrb[0].mxu0 }
  0xe0   :  { %v84_v4 = vpop.f32.mrb[1].mxu0  ;;  %v94_v6 = vmax.f32 %v257_v3, 0.0 }
  0xe1   :  { %v93_v5 = vmax.f32 %v84_v4, 0.0 }
  0xe2   :  { %v99_v8 = vsel %vm95_vm2, %v94_v6, -inf }
  0xe3   :  { %v96_v7 = vsel %vm95_vm2, %v93_v5, -inf }
  0xe4   :  { %97 = vmax.xlane.f32.xlu0 %v96_v7 }
  0xe8   :  { %100 = vmax.xlane.f32.xlu0 %v99_v8 }
 0x171   :  { %v98_v9 = vpop.xlane.xlu0 %97 }
 0x172   :  { %v102_v10 = vsub.f32 %v93_v5, %v98_v9 }
 0x174   :  { %v104_v11 = vmul.f32 1.442695, %v102_v10 }
 0x175   :  { %v101_v12 = vpop.xlane.xlu0 %100 }
 0x176   :  { %279 = vpow2.f32 %v104_v11  ;;  %v103_v13 = vsub.f32 %v94_v6, %v101_v12 }
 0x178   :  { %v106_v14 = vmul.f32 1.442695, %v103_v13 }
 0x17a   :  { %281 = vpow2.f32 %v106_v14 }
 0x180   :  { %v280_v15 = vpop.eup %279 }
 0x181   :  { %v108_v16 = vsel %vm95_vm2, %v280_v15, 0.0 }
 0x182   :  { %109 = vadd.xlane.f32.xlu1 %v108_v16 }
 0x184   :  { %v282_v17 = vpop.eup %281 }
 0x185   :  { %v111_v18 = vsel %vm95_vm2, %v282_v17, 0.0 }
 0x186   :  { %112 = vadd.xlane.f32.xlu1 %v111_v18 }
 0x20f   :  { %v110_v19 = vpop.xlane.xlu1 %109 }
 0x210   :  { %283 = vrcp.f32 %v110_v19 }
 0x213   :  { %v113_v20 = vpop.xlane.xlu1 %112 }
 0x214   :  { %285 = vrcp.f32 %v113_v20 }
 0x21a   :  { %v284_v21 = vpop.eup %283 }
 0x21b   :  { %v115_v22 = vmul.f32 %v284_v21, %v280_v15 }
 0x21d   :  { %129 = vst.msk [vmem:[#allocation2] sm:$0xff] %vm95_vm2, %v115_v22  ;;  %262 = vmatprep.mubr.msk.f32.mxu1 %vm95_vm2, %v115_v22 }
 0x21e   :  { %v286_v23 = vpop.eup %285 }
 0x21f   :  { %v117_v24 = vmul.f32 %v286_v23, %v282_v17 }
 0x221   :  { %130 = vst.msk [vmem:[#allocation2 + $0x8] sm:$0xff] %vm95_vm2, %v117_v24  ;;  %v271_v25 = vpack.c.bf16 %v117_v24, %v115_v22 }
 0x223   :  { %272 = vmatprep.subr.bf16.mxu1 %v271_v25 }
 0x224   :  { %274 = vmatpush3.bf16.msra.mxu1 %v271_v25 }
 0x227   :  { %263 = vmatmul.mubr.msk.f32.vlgmr.msra.gmra.mrb[0].mxu1 %vm95_vm2, %v117_v24 }
 0x2fa   :  { %v264_v32 = vpop.f32.mrb[0].mxu1 }
 0x2fb   :  { %v213_v33 = vmul.f32 2.0, %v264_v32  ;;  %v203_v35 = vpop.f32.mrb[1].mxu1 }
 0x2fc   :  { %v212_v36 = vmul.f32 2.0, %v203_v35 }
 0x2fd   :  { %v215_v37 = vsub.f32 %v213_v33, %v240_v31 }
 0x2fe   :  { %v214_v38 = vsub.f32 %v212_v36, %v239_v34 }
 0x2ff   :  { %218 = vst.msk [vmem:[#allocation2 + $0x18] sm:$0xff] %vm95_vm2, %v215_v37 }
 0x300   :  { %217 = vst.msk [vmem:[#allocation2 + $0x10] sm:$0xff] %vm95_vm2, %v214_v38 }
 0x301   :  { %298 = shalt.err (!%p295_p4)
}
 0x302   :  { %s299_s14 = scalar_lea.hbm %s354_s1, 512 }
 0x303   :  { %p300_p5 = scmp.ne.s32.totalorder %s354_s1, %s299_s14  ;;  %p303_p6 = scmp.lt.u32.totalorder %s299_s14, %s354_s1 }
 0x305   :  { %p305_p7 = pnand %p303_p6, %p300_p5 }
 0x307   :  { %308 = shalt.err (!%p305_p7)
}
 0x308   :  { %s313_s19 = smov 128   ;;  %s314_s20 = smov 8  }
 0x309   :  { %230 = dma.vmem_to_hbm [thread:$0]  %s225_s10, 512, %s354_s1, [#allocation3], %s313_s19, %s313_s19, %s314_s20  }
 0x30a   :  { %309 = dma.done.wait [#allocation3], 512  }
 0x30b   :  { %310 = vsyncadd [#allocation3], 4294966784 }
 0x30c   :  { %234 = vsyncpa [#allocation3], 1 }

</bundles_post_ra>
